<compile_context>
chip_gen: v7x
topology: tpu7x:2x2x1
jax: 0.10.0
libtpu: 0.0.40
codegen_flags: <defaults>
</compile_context>

<pallas_src>
import functools

import jax
import jax.numpy as jnp
from jax.experimental import pallas as pl
from jax.experimental.pallas import tpu as pltpu

EPS = 1e-12  # module default


def _layernorm_kernel(x_ref, g_ref, b_ref, o_ref, *, eps, d_valid):
    x = x_ref[...].astype(jnp.float32)                     # (TB, Dp)
    dp = x.shape[-1]
    mean = jnp.sum(x, axis=-1, keepdims=True) * (1.0 / d_valid)   # (TB, 1)
    xc = x - mean
    if d_valid != dp:
        # Padded lanes hold zeros in x, so the sum for the mean is exact, but
        # (0 - mean)^2 would pollute the variance -> mask before squaring.
        lane = jax.lax.broadcasted_iota(jnp.int32, x.shape, dimension=1)
        xc2 = jnp.where(lane < d_valid, xc * xc, 0.0)
    else:
        xc2 = xc * xc
    # torch x.std(-1) uses the unbiased estimator (divide by D-1).
    var = jnp.sum(xc2, axis=-1, keepdims=True) * (1.0 / (d_valid - 1))
    std = jnp.sqrt(var)
    inv = 1.0 / (std + eps)                                # per-row scalar
    out = xc * inv                                         # broadcast over lanes
    o_ref[...] = (g_ref[...].astype(jnp.float32) * out
                  + b_ref[...].astype(jnp.float32)).astype(o_ref.dtype)


def _physical_vmem_bytes():
    try:
        info = pltpu.get_tpu_info()
        for name in ("vmem_capacity_bytes", "vmem_bytes", "vmem_size_bytes"):
            v = getattr(info, name, None)
            if v:
                return int(v)
    except Exception:
        pass
    return 128 * 1024 * 1024  # conservative default (v5e/v6e)


def layer_norm(x, gamma, beta, eps=EPS):
    """x: (..., d_model); gamma/beta: (d_model,). Returns same shape/dtype as x."""
    orig_shape = x.shape
    d = orig_shape[-1]
    x2 = x.reshape(-1, d)
    r = x2.shape[0]

    # --- lane padding: keep the output store lane-dense (unmasked vst) ------
    d_pad = ((d + 127) // 128) * 128
    if d_pad != d:
        x2 = jnp.pad(x2, ((0, 0), (0, d_pad - d)))
        g2 = jnp.pad(gamma.reshape(1, d), ((0, 0), (0, d_pad - d)))
        b2 = jnp.pad(beta.reshape(1, d), ((0, 0), (0, d_pad - d)))
    else:
        g2 = gamma.reshape(1, d)
        b2 = beta.reshape(1, d)

    # --- VMEM budget (per-generation) ---------------------------------------
    itemsize = jnp.dtype(x.dtype).itemsize
    vmem_phys = _physical_vmem_bytes()
    vmem_limit = int(vmem_phys * 0.75)        # ~48 MiB on v7x, ~96 MiB on v5e/v6e

    # --- row-tile sizing -----------------------------------------------------
    # dtype-aware sublane multiple: 8 for f32, 16 for bf16, 32 for int8/fp8.
    sub = max(8, 32 // itemsize)
    if r <= sub:
        tb = r                                # full extent (tiny input)
    else:
        # Big tiles amortize the ~0.35us/step overhead; budget for
        # double-buffered input + output tiles plus compiler scratch.
        target_tile_bytes = min(8 * 1024 * 1024, vmem_limit // 6)
        tb = max(sub, (target_tile_bytes // (d_pad * itemsize)) // sub * sub)
        # Guarantee >= 2 (ideally >= 4) grid steps so pipelining stays active
        # and v7x's two TensorCores both get work on the "parallel" axis.
        if r >= 4 * sub:
            min_steps = 4
        elif r >= 2 * sub:
            min_steps = 2
        else:
            min_steps = 1
        tb_cap = max(sub, (r // min_steps) // sub * sub)
        tb = min(tb, tb_cap)
    grid = (pl.cdiv(r, tb),)

    cost = pl.CostEstimate(
        flops=8 * r * d,
        transcendentals=2 * r,
        bytes_accessed=(2 * r * d + 2 * d) * itemsize,
    )

    out = pl.pallas_call(
        functools.partial(_layernorm_kernel, eps=eps, d_valid=d),
        out_shape=jax.ShapeDtypeStruct((r, d_pad), x.dtype),
        grid_spec=pltpu.PrefetchScalarGridSpec(
            num_scalar_prefetch=0,
            grid=grid,
            in_specs=[
                pl.BlockSpec((tb, d_pad), lambda i: (i, 0)),   # x row tile
                pl.BlockSpec((1, d_pad), lambda i: (0, 0)),    # gamma (resident)
                pl.BlockSpec((1, d_pad), lambda i: (0, 0)),    # beta  (resident)
            ],
            out_specs=pl.BlockSpec((tb, d_pad), lambda i: (i, 0)),
        ),
        compiler_params=pltpu.CompilerParams(
            dimension_semantics=("parallel",),   # rows independent -> megacore
            vmem_limit_bytes=vmem_limit,
        ),
        cost_estimate=cost,
    )(x2, g2, b2)

    if d_pad != d:
        out = out[:, :d]
    return out.reshape(orig_shape)


def _reference(x, gamma, beta, eps=EPS):
    mean = jnp.mean(x, axis=-1, keepdims=True)
    std = jnp.std(x, axis=-1, keepdims=True, ddof=1)       # torch unbiased std
    return gamma * (x - mean) / (std + eps) + beta


if __name__ == "__main__":
    key = jax.random.PRNGKey(0)

    # Main test: 128-aligned d_model (typical transformer hidden size, scaled down).
    B, S, D = 4, 64, 128
    kx, kg, kb, kx2, kg2, kb2 = jax.random.split(key, 6)
    x = jax.random.normal(kx, (B, S, D), dtype=jnp.float32)
    gamma = 1.0 + 0.1 * jax.random.normal(kg, (D,), dtype=jnp.float32)
    beta = 0.1 * jax.random.normal(kb, (D,), dtype=jnp.float32)

    out = layer_norm(x, gamma, beta)
    jax.block_until_ready(out)
    ref = _reference(x, gamma, beta)
    assert out.shape == ref.shape, (out.shape, ref.shape)
    assert jnp.allclose(out, ref, atol=1e-4, rtol=1e-4), (
        float(jnp.max(jnp.abs(out - ref))))

    # Secondary test: non-128-aligned d_model exercises the lane-padding path.
    B2, S2, D2 = 2, 16, 96
    x2 = jax.random.normal(kx2, (B2, S2, D2), dtype=jnp.float32)
    gamma2 = 1.0 + 0.1 * jax.random.normal(kg2, (D2,), dtype=jnp.float32)
    beta2 = 0.1 * jax.random.normal(kb2, (D2,), dtype=jnp.float32)

    out2 = layer_norm(x2, gamma2, beta2)
    jax.block_until_ready(out2)
    ref2 = _reference(x2, gamma2, beta2)
    assert out2.shape == ref2.shape, (out2.shape, ref2.shape)
    assert jnp.allclose(out2, ref2, atol=1e-4, rtol=1e-4), (
        float(jnp.max(jnp.abs(out2 - ref2))))

    print("KERNEL_OK")
</pallas_src>

<mosaic_0001>
module attributes {stable_mosaic.version = 11 : i64} {
  func.func @_layernorm_kernel(%arg0: i32, %arg1: memref<64x128xf32, #tpu.memory_space<vmem>>, %arg2: memref<1x128xf32, #tpu.memory_space<vmem>>, %arg3: memref<1x128xf32, #tpu.memory_space<vmem>>, %arg4: memref<64x128xf32, #tpu.memory_space<vmem>>) attributes {dimension_semantics = [#tpu.dimension_semantics<parallel>], iteration_bounds = array<i64: 4>, scalar_prefetch = 0 : i64, scratch_operands = 0 : i64, tpu.core_type = #tpu.core_type<tc>, window_params = [{transform_indices = @transform_0, window_bounds = array<i64: 64, 128>}, {pipeline_mode = #tpu.pipeline_mode<synchronous>, transform_indices = @transform_1, window_bounds = array<i64: 1, 128>}, {pipeline_mode = #tpu.pipeline_mode<synchronous>, transform_indices = @transform_2, window_bounds = array<i64: 1, 128>}, {transform_indices = @transform_3, window_bounds = array<i64: 64, 128>}]} {
    %c0 = arith.constant 0 : index
    %c0_0 = arith.constant 0 : index
    %0 = vector.load %arg1[%c0, %c0_0] : memref<64x128xf32, #tpu.memory_space<vmem>>, vector<64x128xf32>
    %cst = arith.constant dense<0.000000e+00> : vector<64xf32>
    %1 = vector.multi_reduction <add>, %0, %cst [1] : vector<64x128xf32> to vector<64xf32>
    %2 = vector.shape_cast %1 : vector<64xf32> to vector<64x1xf32>
    %cst_1 = arith.constant 7.812500e-03 : f32
    %3 = vector.broadcast %cst_1 : f32 to vector<64x1xf32>
    %4 = arith.mulf %2, %3 : vector<64x1xf32>
    %5 = vector.broadcast %4 : vector<64x1xf32> to vector<64x128xf32>
    %6 = arith.subf %0, %5 : vector<64x128xf32>
    %7 = arith.mulf %6, %6 : vector<64x128xf32>
    %cst_2 = arith.constant dense<0.000000e+00> : vector<64xf32>
    %8 = vector.multi_reduction <add>, %7, %cst_2 [1] : vector<64x128xf32> to vector<64xf32>
    %9 = vector.shape_cast %8 : vector<64xf32> to vector<64x1xf32>
    %cst_3 = arith.constant 0.00787401571 : f32
    %10 = vector.broadcast %cst_3 : f32 to vector<64x1xf32>
    %11 = arith.mulf %9, %10 : vector<64x1xf32>
    %12 = math.sqrt %11 : vector<64x1xf32>
    %cst_4 = arith.constant 9.99999996E-13 : f32
    %13 = vector.broadcast %cst_4 : f32 to vector<64x1xf32>
    %14 = arith.addf %12, %13 : vector<64x1xf32>
    %cst_5 = arith.constant 1.000000e+00 : f32
    %15 = vector.broadcast %cst_5 : f32 to vector<64x1xf32>
    %16 = arith.divf %15, %14 : vector<64x1xf32>
    %17 = vector.broadcast %16 : vector<64x1xf32> to vector<64x128xf32>
    %18 = arith.mulf %6, %17 : vector<64x128xf32>
    %c0_6 = arith.constant 0 : index
    %c0_7 = arith.constant 0 : index
    %19 = vector.load %arg2[%c0_6, %c0_7] : memref<1x128xf32, #tpu.memory_space<vmem>>, vector<1x128xf32>
    %20 = vector.broadcast %19 : vector<1x128xf32> to vector<64x128xf32>
    %21 = arith.mulf %20, %18 : vector<64x128xf32>
    %c0_8 = arith.constant 0 : index
    %c0_9 = arith.constant 0 : index
    %22 = vector.load %arg3[%c0_8, %c0_9] : memref<1x128xf32, #tpu.memory_space<vmem>>, vector<1x128xf32>
    %23 = vector.broadcast %22 : vector<1x128xf32> to vector<64x128xf32>
    %24 = arith.addf %21, %23 : vector<64x128xf32>
    %c0_10 = arith.constant 0 : index
    %c0_11 = arith.constant 0 : index
    %25 = vector.load %arg4[%c0_10, %c0_11] : memref<64x128xf32, #tpu.memory_space<vmem>>, vector<64x128xf32>
    tpu.vector_store %arg4[%c0_10, %c0_11], %24 {strides = array<i32>} : memref<64x128xf32, #tpu.memory_space<vmem>>, vector<64x128xf32>,
    return
  }
  func.func @transform_0(%arg0: i32) -> (i32, i32) {
    %c0_i32 = arith.constant 0 : i32
    %c0_i32_0 = arith.constant 0 : i32
    return %arg0, %c0_i32 : i32, i32
  }
  func.func @transform_1(%arg0: i32) -> (i32, i32) {
    %c0_i32 = arith.constant 0 : i32
    %c0_i32_0 = arith.constant 0 : i32
    %c0_i32_1 = arith.constant 0 : i32
    return %c0_i32, %c0_i32_0 : i32, i32
  }
  func.func @transform_2(%arg0: i32) -> (i32, i32) {
    %c0_i32 = arith.constant 0 : i32
    %c0_i32_0 = arith.constant 0 : i32
    %c0_i32_1 = arith.constant 0 : i32
    return %c0_i32, %c0_i32_0 : i32, i32
  }
  func.func @transform_3(%arg0: i32) -> (i32, i32) {
    %c0_i32 = arith.constant 0 : i32
    %c0_i32_0 = arith.constant 0 : i32
    return %arg0, %c0_i32 : i32, i32
  }
}

</mosaic_0001>

<bundles_post_ra>
// kernel: tpu_custom_call.1
= control target key start
LH: loop header
LB: loop body
LE: loop exit
PB: predicated region body
PF: predicated region fallthrough
CT: control target
= control target key end

     0   :  { %8 = vsyncpa [#allocation3], 0  ;;  %s1140_s0 = inlined_call_operand.hbm [shape: f32[256,128], index: 0, kind: input, shape index: {}]   ;;  %s1141_s1 = inlined_call_operand.hbm [shape: f32[1,128], index: 1, kind: input, shape index: {}]   ;;  %s1142_s2 = inlined_call_operand.hbm [shape: f32[1,128], index: 2, kind: input, shape index: {}]   ;;  %s1143_s3 = inlined_call_operand.hbm [shape: f32[256,128], index: 3, kind: output, shape index: {}]  }
   0x1   :  { %10 = vsyncpa [#allocation3 + $0x1], 0 }
   0x2   :  { %11 = vsyncpa [#allocation6], 0 }
   0x3   :  { %12 = vsyncpa [#allocation4], 0 }
   0x4   :  { %14 = vsyncpa [#allocation4 + $0x1], 0  ;;  %s831_s12 = smov 0   ;;  %s833_s13 = smov 0  }
   0x5   :  { %s835_s14 = smov 0   ;;  %s837_s15 = smov 0  }
   0x6 LB: > { %s852_s16 = sadd.s32 4294967295, %s801_s15   ;;  %s520_s17 = sadd.s32 4294967294, %s801_s15   ;;  %s801_s15 = sphi %s837_s15, %s1166_s15   ;;  %s797_s14 = sphi %s835_s14, %s1165_s14   ;;  %s793_s13 = sphi %s833_s13, %s1164_s13   ;;  %s789_s12 = sphi %s831_s12, %s1163_s12  }
   0x7   : > { %s856_s18 = sadd.s32 1, %s801_s15   ;;  %s27_s19 = sadd.s32 1, %s797_s14 }
   0x8   : > { %s24_s20 = ssub.s32 %s801_s15, %s856_s18  ;;  %p34_p0 = scmp.ne.s32.totalorder %s797_s14, %s793_s13 }
   0x9   : > { %p25_p1 = scmp.eq.s32.totalorder %s24_s20, 0  ;;  %p35_p2 = scmp.eq.s32.totalorder %s801_s15, 0 }
   0xa   : > { %p40_p3 = scmp.ne.s32.totalorder %s793_s13, %s789_s12  ;;  %p1144_p4 = scmp.eq.s32.totalorder %s852_s16, 0 }
   0xb   : > { %s868_s21 = scalar_select %p25_p1, %s797_s14, %s27_s19  }
   0xc   : > { %p870_p5 = por %p35_p2, %p34_p0  ;;  %p876_p6 = por %p1144_p4, %p40_p3 }
   0xd   : > { %p106_p7 = scmp.eq.s32.totalorder %s852_s16, 3  ;;  %p112_p8 = scmp.eq.s32.totalorder %s520_s17, 3 }
   0xe   : > { %s1150_s23 = scalar_select %p876_p6, 1, 0 }
   0xf   : > { %p521_p9 = scmp.ge.s32.totalorder %s801_s15, 1  ;;  %p119_p10 = scmp.lt.s32.totalorder %s801_s15, 5 }
  0x10   : > { %p883_p11 = por %p106_p7, %p34_p0  ;;  %p887_p12 = por %p112_p8, %p40_p3 }
  0x11   : > { %p891_p13 = pnand %p521_p9, %p119_p10  ;;  %s803_s27 = smov [#allocation5]  }
  0x12   : > { %s1151_s24 = scalar_select %p883_p11, 1, 0 }
  0x13   : > { %s1152_s25 = scalar_select %p887_p12, 1, 0 }
  0x14   : > { %s1153_s26 = scalar_select %p891_p13, 1, 0 }
  0x15   : > { %p554_p1 = pneg %p891_p13  ;;  %s132_s28 = sshll.u32 %s803_s27, 4  ;;  %s133_s28 = int_to_ptr.vmem [resolvable:$true] %s132_s28 }
  0x16   : > { %p571_p2 = scmp.lt.s32.totalorder %s801_s15, 4  ;;  %s804_s4 = smov [#allocation7]  }
  0x17   : > { %p900_p0 = pnand %p554_p1, %p1144_p4  ;;  %s143_s5 = sshll.u32 %s804_s4, 4  ;;  %s910_s5 = int_to_ptr.vmem [resolvable:$true] %s143_s5 }
  0x18   : > { %p906_p3 = pnand %p571_p2, %p870_p5  ;;  %s645_s8 = scalar_lea.hbm %s1141_s1, 16 }
  0x19   : > { %p646_p7 = scmp.ne.s32.totalorder %s1141_s1, %s645_s8  ;;  %p647_p8 = pneg %p900_p0 }
  0x1a   : > { %s1155_s30 = scalar_select %p906_p3, 1, 0 }
  0x1b   : > { %p648_p5 = pnand %p647_p8, %p646_p7  ;;  %p652_p10 = scmp.lt.u32.totalorder %s645_s8, %s1141_s1 }
  0x1d   : > { %p649_p9 = pneg %p648_p5 }
  0x1f   : > { %p654_p1 = pnand %p652_p10, %p649_p9 }
  0x21   : > { %657 = shalt.err (!%p654_p1)
}
  0x22   : > { %s658_s19 = scalar_lea.vmem %s133_s28, 16  ;;  %s665_s20 = scalar_lea.vmem %s133_s28, 32 }
  0x23   : > { %p659_p2 = scmp.ne.s32.totalorder %s133_s28, %s658_s19  ;;  %p666_p11 = scmp.lt.s32.totalorder %s133_s28, %s133_s28 }
  0x24   : > { %p667_p6 = scmp.lt.s32.totalorder %s665_s20, %s658_s19 }
  0x25   : > { %p661_p4 = pnand %p659_p2, %p647_p8 }
  0x26   : > { %p668_p13 = por %p667_p6, %p666_p11 }
  0x27   : > { %p662_p12 = pneg %p661_p4 }
  0x29   : > { %p669_p3 = pnand %p668_p13, %p662_p12 }
  0x2b   : > { %672 = shalt.err (!%p669_p3)
}
  0x2c   : > { %557 = dma.hbm_to_vmem [thread:$0]  (!%p900_p0), %s1141_s1, 16, %s133_s28, [#allocation6]  }
  0x2d   : > { %s154_s4 = sand.u32 1, %s797_s14   ;;  %s673_s8 = scalar_lea.hbm %s1142_s2, 16 }
  0x2e   : > { %p674_p4 = scmp.ne.s32.totalorder %s1142_s2, %s673_s8  ;;  %p680_p12 = scmp.lt.u32.totalorder %s673_s8, %s1142_s2 }
  0x30   : > { %p676_p6 = pnand %p674_p4, %p647_p8 }
  0x32   : > { %p677_p11 = pneg %p676_p6 }
  0x34   : > { %p682_p13 = pnand %p680_p12, %p677_p11 }
  0x36   : > { %685 = shalt.err (!%p682_p13)
}
  0x37   : > { %s686_s28 = scalar_lea.vmem %s910_s5, 16  ;;  %s693_s19 = scalar_lea.vmem %s910_s5, 32 }
  0x38   : > { %p687_p3 = scmp.ne.s32.totalorder %s910_s5, %s686_s28  ;;  %p694_p9 = scmp.lt.s32.totalorder %s910_s5, %s910_s5 }
  0x39   : > { %p695_p10 = scmp.lt.s32.totalorder %s693_s19, %s686_s28 }
  0x3a   : > { %p689_p7 = pnand %p687_p3, %p647_p8 }
  0x3b   : > { %p696_p1 = por %p695_p10, %p694_p9 }
  0x3c   : > { %p690_p5 = pneg %p689_p7 }
  0x3e   : > { %p697_p2 = pnand %p696_p1, %p690_p5 }
  0x40   : > { %700 = shalt.err (!%p697_p2)
}
  0x41   : > { %560 = dma.hbm_to_vmem [thread:$0]  (!%p900_p0), %s1142_s2, 16, %s910_s5, [#allocation6]  }
  0x42   : > { %s525_s27 = sshll.u32 %s154_s4, 6  ;;  %s540_s6 = sshll.u32 %s801_s15, 10 }
  0x43   : > { %s965_s9 = scalar_lea.hbm %s1140_s0, %s540_s6  ;;  %s158_s29 = scalar_lea.vmem [#allocation2], %s525_s27 }
  0x44   : > { %s165_s10 = sshll.u32 %s158_s29, 4  ;;  %s969_s11 = scalar_lea.sflag [#allocation3], %s154_s4  ;;  %s967_s10 = int_to_ptr.vmem [resolvable:$true] %s165_s10 }
  0x45   : > { %s701_s17 = scalar_lea.hbm %s965_s9, 1024  ;;  %p1156_p0 = scmp.ne.s32.totalorder %s1155_s30, 0 }
  0x46   : > { %p702_p8 = scmp.ne.s32.totalorder %s965_s9, %s701_s17  ;;  %s706_s19 = scalar_lea.hbm %s1140_s0, 4096 }
  0x47   : > { %p703_p4 = pneg %p1156_p0  ;;  %p707_p12 = scmp.lt.u32.totalorder %s965_s9, %s1140_s0 }
  0x48   : > { %p708_p13 = scmp.lt.u32.totalorder %s706_s19, %s701_s17  ;;  %p710_p7 = scmp.lt.u32.totalorder %s701_s17, %s965_s9 }
  0x49   : > { %p704_p6 = pnand %p703_p4, %p702_p8 }
  0x4a   : > { %p709_p3 = por %p708_p13, %p707_p12 }
  0x4b   : > { %p705_p11 = pneg %p704_p6 }
  0x4c   : > { %p711_p5 = por %p710_p7, %p709_p3 }
  0x4e   : > { %p712_p9 = pnand %p711_p5, %p705_p11 }
  0x50   : > { %715 = shalt.err (!%p712_p9)
}
  0x51   : > { %s716_s4 = scalar_lea.vmem %s967_s10, 1024  ;;  %s805_s27 = smov [#allocation2]  }
  0x52   : > { %p717_p10 = scmp.ne.s32.totalorder %s967_s10, %s716_s4  ;;  %s721_s6 = sshll.u32 %s805_s27, 4  ;;  %s722_s6 = int_to_ptr.vmem [resolvable:$false] %s721_s6 }
  0x53   : > { %s723_s7 = scalar_lea.vmem %s722_s6, 2048  ;;  %p724_p8 = scmp.lt.s32.totalorder %s967_s10, %s722_s6 }
  0x54   : > { %p719_p1 = pnand %p717_p10, %p703_p4  ;;  %p725_p6 = scmp.lt.s32.totalorder %s723_s7, %s716_s4 }
  0x56   : > { %p720_p2 = pneg %p719_p1  ;;  %p726_p12 = por %p725_p6, %p724_p8 }
  0x58   : > { %p727_p13 = pnand %p726_p12, %p720_p2 }
  0x5a   : > { %730 = shalt.err (!%p727_p13)
}
  0x5b   : > { %s806_s8 = smov 128   ;;  %s807_s29 = smov 8  }
  0x5c   : > { %564 = dma.hbm_to_vmem [thread:$0]  (!%p1156_p0), %s965_s9, 1024, %s967_s10, %s969_s11, %s806_s8, %s806_s8, %s807_s29  }
  0x5d   : > { %p1157_p4 = scmp.ne.s32.totalorder %s1153_s26, 0 }
  0x5e   : > { %s1000_s17 = sand.u32 (!%p1157_p4), 1, %s793_s13   ;;  %p1158_p11 = scmp.ne.s32.totalorder (!%p1157_p4), %s1150_s23, 0 }
  0x5f   : > { %177 = sbr.rel (%p1157_p4) target bundleno = 464 (0x1d0), region = 32  ;;  %s529_s5 = sshll.u32 (!%p1157_p4), %s1000_s17, 6 }
  0x60   : > { %s180_s28 = scalar_lea.sflag (!%p1157_p4), [#allocation3], %s1000_s17  ;;  %s183_s19 = scalar_lea.vmem (!%p1157_p4), [#allocation2], %s529_s5 }
  0x66   : > { %776 = dma.done.wait (%p1158_p11), %s180_s28, 1024  }
  0x67   : > { %778 = vsyncadd (%p1158_p11), %s180_s28, 4294966272  ;;  %p1159_p0 = scmp.eq.s32.totalorder %s852_s16, 0 }
  0x69   : > { %780 = dma.done.wait (%p1159_p0), [#allocation6], 32   ;;  %p1160_p3 = pmov %p1159_p0 }
  0x6a   : > { %v216_v0 = vld [vmem:[%s183_s19] sm:$0xff]  ;;  %v218_v1 = vld [vmem:[%s183_s19 + $0x10] sm:$0xff]  ;;  %v217_v2 = vld [vmem:[%s183_s19 + $0x8] sm:$0xff]  ;;  %s1075_s23 = scalar_lea.vmem [#allocation8], %s529_s5  ;;  %s541_s26 = sshll.u32 %s852_s16, 10 }
  0x6b   : > { %782 = vsyncadd (%p1160_p3), [#allocation6], 4294967264  ;;  %224 = vadd.xlane.f32.xlu0 %v216_v0  ;;  %228 = vadd.xlane.f32.xlu1 %v218_v1  ;;  %v219_v3 = vld [vmem:[%s183_s19 + $0x18] sm:$0xff]  ;;  %v220_v4 = vld [vmem:[%s183_s19 + $0x20] sm:$0xff]  ;;  %s428_s30 = sshll.u32 %s1075_s23, 4  ;;  %s1094_s11 = scalar_lea.hbm %s1143_s3, %s541_s26  ;;  %s1096_s30 = int_to_ptr.vmem [resolvable:$true] %s428_s30 }
  0x6c   : > { %v221_v5 = vld [vmem:[%s183_s19 + $0x28] sm:$0xff]  ;;  %v222_v6 = vld [vmem:[%s183_s19 + $0x30] sm:$0xff]  ;;  %v223_v7 = vld [vmem:[%s183_s19 + $0x38] sm:$0xff]  ;;  %s415_s20 = scalar_lea.sflag [#allocation4], %s1000_s17  ;;  %s731_s22 = scalar_lea.vmem %s1096_s30, 1024 }
  0x6d   : > { %p732_p7 = scmp.ne.s32.totalorder %s1096_s30, %s731_s22  ;;  %p1161_p5 = scmp.ne.s32.totalorder %s1151_s24, 0 }
  0x6e   : > { %s808_s16 = smov [#allocation8]  }
  0x6f   : > { %226 = vadd.xlane.f32.xlu0 %v217_v2  ;;  %230 = vadd.xlane.f32.xlu1 %v219_v3  ;;  %p733_p9 = pnand %p732_p7, %p1161_p5  ;;  %s735_s4 = sshll.u32 %s808_s16, 4  ;;  %s736_s4 = int_to_ptr.vmem [resolvable:$false] %s735_s4 }
  0x70   : > { %s737_s27 = scalar_lea.vmem %s736_s4, 2048  ;;  %p738_p1 = scmp.lt.s32.totalorder %s1096_s30, %s736_s4 }
  0x71   : > { %p734_p10 = pneg %p733_p9  ;;  %p739_p2 = scmp.lt.s32.totalorder %s737_s27, %s731_s22 }
  0x73   : > { %232 = vadd.xlane.f32.xlu0 %v220_v4  ;;  %234 = vadd.xlane.f32.xlu1 %v221_v5  ;;  %p740_p8 = por %p739_p2, %p738_p1 }
  0x75   : > { %p741_p6 = pnand %p740_p8, %p734_p10 }
  0x77   : > { %236 = vadd.xlane.f32.xlu0 %v222_v6  ;;  %238 = vadd.xlane.f32.xlu1 %v223_v7 }
  0xf8   : > { %v225_v8 = vpop.xlane.xlu0 %224  ;;  %v229_v9 = vpop.xlane.xlu1 %228 }
  0xf9   : > { %v240_v10 = vmul.f32 0.0078125, %v225_v8  ;;  %v242_v11 = vmul.f32 0.0078125, %v229_v9 }
  0xfb   : > { %v1014_v12 = vsub.f32 %v216_v0, %v240_v10  ;;  %v1016_v13 = vsub.f32 %v218_v1, %v242_v11 }
  0xfc   : > { %v227_v14 = vpop.xlane.xlu0 %226  ;;  %v231_v15 = vpop.xlane.xlu1 %230 }
  0xfd   : > { %v241_v16 = vmul.f32 0.0078125, %v227_v14  ;;  %v256_v17 = vmul.f32 %v1014_v12, %v1014_v12  ;;  %v243_v18 = vmul.f32 0.0078125, %v231_v15  ;;  %v258_v21 = vmul.f32 %v1016_v13, %v1016_v13 }
  0xff   : > { %v1020_v19 = vsub.f32 %v217_v2, %v241_v16  ;;  %264 = vadd.xlane.f32.xlu0 %v256_v17  ;;  %v1022_v20 = vsub.f32 %v219_v3, %v243_v18 }
 0x100   : > { %v233_v22 = vpop.xlane.xlu0 %232  ;;  %v235_v23 = vpop.xlane.xlu1 %234 }
 0x101   : > { %v244_v24 = vmul.f32 0.0078125, %v233_v22  ;;  %v257_v25 = vmul.f32 %v1020_v19, %v1020_v19  ;;  %v245_v26 = vmul.f32 0.0078125, %v235_v23  ;;  %v259_v29 = vmul.f32 %v1022_v20, %v1022_v20 }
 0x103   : > { %v1028_v27 = vsub.f32 %v220_v4, %v244_v24  ;;  %268 = vadd.xlane.f32.xlu0 %v258_v21  ;;  %266 = vadd.xlane.f32.xlu1 %v257_v25  ;;  %v1030_v28 = vsub.f32 %v221_v5, %v245_v26 }
 0x104   : > { %v237_v30 = vpop.xlane.xlu0 %236  ;;  %v239_v31 = vpop.xlane.xlu1 %238 }
 0x105   : > { %v246_v32 = vmul.f32 0.0078125, %v237_v30  ;;  %v260_v33 = vmul.f32 %v1028_v27, %v1028_v27  ;;  %v247_v34 = vmul.f32 0.0078125, %v239_v31  ;;  %v261_v37 = vmul.f32 %v1030_v28, %v1030_v28 }
 0x107   : > { %v1036_v35 = vsub.f32 %v222_v6, %v246_v32  ;;  %270 = vadd.xlane.f32.xlu1 %v259_v29  ;;  %272 = vadd.xlane.f32.xlu0 %v260_v33  ;;  %v1038_v36 = vsub.f32 %v223_v7, %v247_v34 }
 0x109   : > { %v262_v38 = vmul.f32 %v1036_v35, %v1036_v35  ;;  %v263_v39 = vmul.f32 %v1038_v36, %v1038_v36 }
 0x10b   : > { %274 = vadd.xlane.f32.xlu1 %v261_v37  ;;  %276 = vadd.xlane.f32.xlu0 %v262_v38 }
 0x10f   : > { %278 = vadd.xlane.f32.xlu1 %v263_v39 }
 0x18c   : > { %v265_v40 = vpop.xlane.xlu0 %264 }
 0x18d   : > { %v280_v41 = vmul.f32 0.007874016, %v265_v40 }
 0x18f   : > { %613 = vrsqrt.f32 %v280_v41  ;;  %vm290_vm0 = vcmp.eq.f32.partialorder %v280_v41, inf  ;;  %v293_v56 = vand.u32 2147483648, %v280_v41  ;;  %vm292_vm1 = vcmp.eq.f32.partialorder %v280_v41, 0.0 }
 0x190   : > { %v267_v42 = vpop.xlane.xlu1 %266  ;;  %v269_v43 = vpop.xlane.xlu0 %268 }
 0x191   : > { %v281_v44 = vmul.f32 0.007874016, %v267_v42  ;;  %v282_v45 = vmul.f32 0.007874016, %v269_v43 }
 0x193   : > { %615 = vrsqrt.f32 %v281_v44  ;;  %vm297_vm2 = vcmp.eq.f32.partialorder %v281_v44, inf  ;;  %vm299_vm3 = vcmp.eq.f32.partialorder %v281_v44, 0.0  ;;  %v300_v1 = vand.u32 2147483648, %v281_v44 }
 0x194   : > { %617 = vrsqrt.f32 %v282_v45  ;;  %v271_v46 = vpop.xlane.xlu1 %270  ;;  %v273_v47 = vpop.xlane.xlu0 %272  ;;  %vm304_vm4 = vcmp.eq.f32.partialorder %v282_v45, inf  ;;  %v307_v4 = vand.u32 2147483648, %v282_v45  ;;  %vm306_vm5 = vcmp.eq.f32.partialorder %v282_v45, 0.0 }
 0x195   : > { %v283_v48 = vmul.f32 0.007874016, %v271_v46  ;;  %v284_v49 = vmul.f32 0.007874016, %v273_v47 }
 0x197   : > { %619 = vrsqrt.f32 %v283_v48  ;;  %vm311_vm6 = vcmp.eq.f32.partialorder %v283_v48, inf  ;;  %vm313_vm7 = vcmp.eq.f32.partialorder %v283_v48, 0.0  ;;  %v314_v15 = vand.u32 2147483648, %v283_v48 }
 0x198   : > { %621 = vrsqrt.f32 %v284_v49  ;;  %v275_v50 = vpop.xlane.xlu1 %274  ;;  %v277_v51 = vpop.xlane.xlu0 %276  ;;  %vm318_vm8 = vcmp.eq.f32.partialorder %v284_v49, inf  ;;  %v321_v18 = vand.u32 2147483648, %v284_v49  ;;  %vm320_vm9 = vcmp.eq.f32.partialorder %v284_v49, 0.0 }
 0x199   : > { %v614_v52 = vpop.eup %613  ;;  %v1046_v53 = vmul.f32 0.007874016, %v275_v50  ;;  %v1048_v54 = vmul.f32 0.007874016, %v277_v51 }
 0x19a   : > { %v289_v55 = vmul.f32 %v614_v52, %v280_v41 }
 0x19b   : > { %623 = vrsqrt.f32 %v1046_v53  ;;  %vm325_vm10 = vcmp.eq.f32.partialorder %v1046_v53, inf  ;;  %vm327_vm11 = vcmp.eq.f32.partialorder %v1046_v53, 0.0  ;;  %v328_v31 = vand.u32 2147483648, %v1046_v53 }
 0x19c   : > { %v291_v57 = vsel %vm290_vm0, %v280_v41, %v289_v55  ;;  %625 = vrsqrt.f32 %v1048_v54  ;;  %v279_v58 = vpop.xlane.xlu1 %278  ;;  %vm332_vm12 = vcmp.eq.f32.partialorder %v1048_v54, inf  ;;  %v335_v34 = vand.u32 2147483648, %v1048_v54  ;;  %v533_v41 = vld [vmem:[#allocation5] ss:$0 sm:$0xff] }
 0x19d   : > { %v616_v59 = vpop.eup %615  ;;  %v294_v60 = vsel %vm292_vm1, %v293_v56, %v291_v57  ;;  %v1052_v61 = vmul.f32 0.007874016, %v279_v58  ;;  %vm334_vm13 = vcmp.eq.f32.partialorder %v1048_v54, 0.0 }
 0x19e   : > { %v618_v62 = vpop.eup %617  ;;  %v344_v63 = vadd.f32 1e-12, %v294_v60  ;;  %v296_v0 = vmul.f32 %v616_v59, %v281_v44 }
 0x19f   : > { %v303_v2 = vmul.f32 %v618_v62, %v282_v45  ;;  %627 = vrsqrt.f32 %v1052_v61  ;;  %vm339_vm14 = vcmp.eq.f32.partialorder %v1052_v61, inf  ;;  %v342_v47 = vand.u32 2147483648, %v1052_v61 }
 0x1a0   : > { %629 = vrcp.f32 %v344_v63  ;;  %v298_v3 = vsel %vm297_vm2, %v281_v44, %v296_v0  ;;  %vm341_vm15 = vcmp.eq.f32.partialorder %v1052_v61, 0.0 }
 0x1a1   : > { %v620_v5 = vpop.eup %619  ;;  %v301_v6 = vsel %vm299_vm3, %v300_v1, %v298_v3  ;;  %v305_v7 = vsel %vm304_vm4, %v282_v45, %v303_v2 }
 0x1a2   : > { %v622_v8 = vpop.eup %621  ;;  %v345_v9 = vadd.f32 1e-12, %v301_v6  ;;  %v308_v10 = vsel %vm306_vm5, %v307_v4, %v305_v7  ;;  %v310_v11 = vmul.f32 %v620_v5, %v283_v48 }
 0x1a3   : > { %v346_v14 = vadd.f32 1e-12, %v308_v10  ;;  %v317_v16 = vmul.f32 %v622_v8, %v284_v49 }
 0x1a4   : > { %631 = vrcp.f32 %v345_v9  ;;  %v312_v17 = vsel %vm311_vm6, %v283_v48, %v310_v11  ;;  %v534_v48 = vld [vmem:[#allocation7] ss:$0 sm:$0xff] }
 0x1a5   : > { %v624_v21 = vpop.eup %623  ;;  %633 = vrcp.f32 %v346_v14  ;;  %v315_v22 = vsel %vm313_vm7, %v314_v15, %v312_v17  ;;  %v319_v23 = vsel %vm318_vm8, %v284_v49, %v317_v16 }
 0x1a6   : > { %v626_v24 = vpop.eup %625  ;;  %v347_v25 = vadd.f32 1e-12, %v315_v22  ;;  %v322_v26 = vsel %vm320_vm9, %v321_v18, %v319_v23  ;;  %v324_v29 = vmul.f32 %v624_v21, %v1046_v53 }
 0x1a7   : > { %v348_v30 = vadd.f32 1e-12, %v322_v26  ;;  %v331_v32 = vmul.f32 %v626_v24, %v1048_v54 }
 0x1a8   : > { %635 = vrcp.f32 %v347_v25  ;;  %v326_v33 = vsel %vm325_vm10, %v1046_v53, %v324_v29 }
 0x1a9   : > { %v628_v37 = vpop.eup %627  ;;  %637 = vrcp.f32 %v348_v30  ;;  %v329_v38 = vsel %vm327_vm11, %v328_v31, %v326_v33  ;;  %v333_v39 = vsel %vm332_vm12, %v1048_v54, %v331_v32 }
 0x1aa   : > { %v630_v40 = vpop.eup %629  ;;  %v349_v42 = vadd.f32 1e-12, %v329_v38  ;;  %v336_v43 = vsel %vm334_vm13, %v335_v34, %v333_v39  ;;  %v338_v44 = vmul.f32 %v628_v37, %v1052_v61 }
 0x1ab   : > { %v368_v45 = vmul.f32 %v630_v40, %v1014_v12  ;;  %v350_v46 = vadd.f32 1e-12, %v336_v43 }
 0x1ac   : > { %639 = vrcp.f32 %v349_v42  ;;  %v340_v49 = vsel %vm339_vm14, %v1052_v61, %v338_v44 }
 0x1ad   : > { %v383_v50 = vmul.f32 %v533_v41, %v368_v45  ;;  %641 = vrcp.f32 %v350_v46  ;;  %v343_v51 = vsel %vm341_vm15, %v342_v47, %v340_v49 }
 0x1ae   : > { %v632_v52 = vpop.eup %631  ;;  %v351_v53 = vadd.f32 1e-12, %v343_v51 }
 0x1af   : > { %v634_v54 = vpop.eup %633  ;;  %v398_v55 = vadd.f32 %v534_v48, %v383_v50  ;;  %v369_v12 = vmul.f32 %v632_v52, %v1020_v19 }
 0x1b0   : > { %v370_v56 = vmul.f32 %v634_v54, %v1016_v13  ;;  %643 = vrcp.f32 %v351_v53 }
 0x1b1   : > { %406 = vst [vmem:[%s1075_s23] sm:$0xff] %v398_v55  ;;  %v384_v57 = vmul.f32 %v533_v41, %v369_v12 }
 0x1b2   : > { %v636_v58 = vpop.eup %635  ;;  %v385_v59 = vmul.f32 %v533_v41, %v370_v56 }
 0x1b3   : > { %v638_v60 = vpop.eup %637  ;;  %v399_v61 = vadd.f32 %v534_v48, %v384_v57  ;;  %v371_v62 = vmul.f32 %v636_v58, %v1022_v20 }
 0x1b4   : > { %v400_v19 = vadd.f32 %v534_v48, %v385_v59  ;;  %v372_v13 = vmul.f32 %v638_v60, %v1028_v27 }
 0x1b5   : > { %407 = vst [vmem:[%s1075_s23 + $0x8] sm:$0xff] %v399_v61  ;;  %v386_v63 = vmul.f32 %v533_v41, %v371_v62 }
 0x1b6   : > { %v640_v0 = vpop.eup %639  ;;  %408 = vst [vmem:[%s1075_s23 + $0x10] sm:$0xff] %v400_v19  ;;  %v387_v1 = vmul.f32 %v533_v41, %v372_v13 }
 0x1b7   : > { %v642_v2 = vpop.eup %641  ;;  %v401_v3 = vadd.f32 %v534_v48, %v386_v63  ;;  %v373_v4 = vmul.f32 %v640_v0, %v1030_v28 }
 0x1b8   : > { %v402_v5 = vadd.f32 %v534_v48, %v387_v1  ;;  %v374_v20 = vmul.f32 %v642_v2, %v1036_v35 }
 0x1b9   : > { %409 = vst [vmem:[%s1075_s23 + $0x18] sm:$0xff] %v401_v3  ;;  %v388_v6 = vmul.f32 %v533_v41, %v373_v4 }
 0x1ba   : > { %v644_v27 = vpop.eup %643  ;;  %410 = vst [vmem:[%s1075_s23 + $0x20] sm:$0xff] %v402_v5  ;;  %v389_v7 = vmul.f32 %v533_v41, %v374_v20 }
 0x1bb   : > { %v403_v8 = vadd.f32 %v534_v48, %v388_v6  ;;  %v375_v9 = vmul.f32 %v644_v27, %v1038_v36 }
 0x1bc   : > { %v404_v10 = vadd.f32 %v534_v48, %v389_v7 }
 0x1bd   : > { %411 = vst [vmem:[%s1075_s23 + $0x28] sm:$0xff] %v403_v8  ;;  %v390_v11 = vmul.f32 %v533_v41, %v375_v9 }
 0x1be   : > { %412 = vst [vmem:[%s1075_s23 + $0x30] sm:$0xff] %v404_v10 }
 0x1bf   : > { %v405_v28 = vadd.f32 %v534_v48, %v390_v11 }
 0x1c1   : > { %413 = vst [vmem:[%s1075_s23 + $0x38] sm:$0xff] %v405_v28 }
 0x1c2   : > { %744 = shalt.err (!%p741_p6)
}
 0x1c3   : > { %s745_s6 = scalar_lea.hbm %s1094_s11, 1024  ;;  %s749_s29 = scalar_lea.hbm %s1143_s3, 4096 }
 0x1c4   : > { %p746_p12 = scmp.ne.s32.totalorder %s1094_s11, %s745_s6  ;;  %p750_p11 = scmp.lt.u32.totalorder %s1094_s11, %s1143_s3 }
 0x1c5   : > { %p751_p0 = scmp.lt.u32.totalorder %s749_s29, %s745_s6  ;;  %p753_p7 = scmp.lt.u32.totalorder %s745_s6, %s1094_s11 }
 0x1c6   : > { %p747_p13 = pnand %p746_p12, %p1161_p5 }
 0x1c7   : > { %p752_p3 = por %p751_p0, %p750_p11 }
 0x1c8   : > { %p748_p4 = pneg %p747_p13 }
 0x1c9   : > { %p754_p9 = por %p753_p7, %p752_p3 }
 0x1cb   : > { %p755_p10 = pnand %p754_p9, %p748_p4 }
 0x1cd   : > { %758 = shalt.err (!%p755_p10)
}
 0x1ce   : > { %s809_s19 = smov 128   ;;  %s810_s23 = smov 8  }
 0x1cf   : > { %552 = dma.vmem_to_hbm [thread:$0]  (%p1161_p5), %s1096_s30, 1024, %s1094_s11, %s415_s20, %s809_s19, %s809_s19, %s810_s23  }
 0x1d0 PF: > { %p574_p1 = scmp.ge.s32.totalorder %s801_s15, 2  ;;  %s443_s26 = sand.u32 1, %s789_s12  }
 0x1d1   : > { %p1162_p2 = scmp.ne.s32.totalorder %s1152_s25, 0  ;;  %s444_s9 = scalar_lea.sflag [#allocation4], %s443_s26 }
 0x1d3   : > { %p566_p8 = pnand %p574_p1, %p1162_p2 }
 0x1d5   : > { %784 = dma.done.wait (!%p566_p8), %s444_s9, 1024  }
 0x1d6   : > { %786 = vsyncadd (!%p566_p8), %s444_s9, 4294966272  ;;  %p17_p6 = scmp.ge.s32.totalorder %s856_s18, 6   ;;  %s1163_s12 = smov %s793_s13 }
 0x1d7   : > { %s1164_s13 = smov %s797_s14  ;;  %s1165_s14 = smov %s868_s21 }
 0x1d8   : > { %s1166_s15 = smov %s856_s18  ;;  %19 = sbr.rel (!%p17_p6) target bundleno = 6 (0x6), region = 85 }
 0x1df   :  { %449 = vsyncpa [#allocation3], 1 }
 0x1e0   :  { %451 = vsyncpa [#allocation3 + $0x1], 1 }
 0x1e1   :  { %452 = vsyncpa [#allocation6], 1 }
 0x1e2   :  { %453 = vsyncpa [#allocation4], 1 }
 0x1e3   :  { %455 = vsyncpa [#allocation4 + $0x1], 1 }

</bundles_post_ra>
